<compile_context>
chip_gen: v5e
topology: v5e:2x2
jax: 0.10.0
libtpu: 0.0.40
codegen_flags: <defaults>
</compile_context>

<pallas_src>
import jax
import jax.numpy as jnp
from jax.experimental import pallas as pl
from jax.experimental.pallas import tpu as pltpu


def _round_up(x, m):
    return (x + m - 1) // m * m


def _ode_func_kernel(y_ref, w1_ref, b1_ref, w2_ref, b2_ref, w3_ref, b3_ref,
                     out_ref):
    """Fused 3-layer tanh MLP over one batch tile.

    Matmuls accumulate in f32 (MXU); bias-add and tanh stay in f32 (VPU/EUP,
    works on every TPU generation); final cast only at the store.
    """
    y = y_ref[...]
    h = jnp.tanh(
        jnp.dot(y, w1_ref[...], preferred_element_type=jnp.float32)
        + b1_ref[...].astype(jnp.float32))
    h = h.astype(w2_ref.dtype)
    h = jnp.tanh(
        jnp.dot(h, w2_ref[...], preferred_element_type=jnp.float32)
        + b2_ref[...].astype(jnp.float32))
    h = h.astype(w3_ref.dtype)
    grad = (jnp.dot(h, w3_ref[...], preferred_element_type=jnp.float32)
            + b3_ref[...].astype(jnp.float32))
    out_ref[...] = grad.astype(out_ref.dtype)


def ode_func_forward(t_local, y, params, backwards=False, *,
                     max_batch_tile=512):
    """Pallas equivalent of ODEFunc.forward.

    t_local is accepted for API parity but unused (matches
    get_ode_gradient_nn, which only calls gradient_net(y)).
    """
    del t_local  # unused by the reference module
    w1, b1, w2, b2, w3, b3 = params

    # Fold the backwards negation into the last layer (free, done in wrapper).
    if backwards:
        w3 = -w3
        b3 = -b3

    orig_shape = y.shape
    latent_dim = orig_shape[-1]
    y2d = y.reshape(-1, latent_dim)
    B = y2d.shape[0]

    # Batch tile: one grid step when the (8-padded) batch fits in one tile,
    # otherwise large 512-row tiles streamed over a "parallel" grid axis.
    tile = min(_round_up(B, 8), _round_up(max_batch_tile, 8))
    B_pad = _round_up(B, tile)
    if B_pad != B:
        y2d = jnp.pad(y2d, ((0, B_pad - B), (0, 0)))

    n_units = w1.shape[1]
    grid = (B_pad // tile,)

    out2d = pl.pallas_call(
        _ode_func_kernel,
        out_shape=jax.ShapeDtypeStruct((B_pad, latent_dim), y2d.dtype),
        grid_spec=pltpu.PrefetchScalarGridSpec(
            num_scalar_prefetch=0,
            grid=grid,
            in_specs=[
                pl.BlockSpec((tile, latent_dim), lambda i: (i, 0)),
                pl.BlockSpec((latent_dim, n_units), lambda i: (0, 0)),
                pl.BlockSpec((1, n_units), lambda i: (0, 0)),
                pl.BlockSpec((n_units, n_units), lambda i: (0, 0)),
                pl.BlockSpec((1, n_units), lambda i: (0, 0)),
                pl.BlockSpec((n_units, latent_dim), lambda i: (0, 0)),
                pl.BlockSpec((1, latent_dim), lambda i: (0, 0)),
            ],
            out_specs=pl.BlockSpec((tile, latent_dim), lambda i: (i, 0)),
        ),
        compiler_params=pltpu.CompilerParams(
            dimension_semantics=("parallel",)),
    )(y2d, w1, b1, w2, b2, w3, b3)

    if B_pad != B:
        out2d = out2d[:B]
    return out2d.reshape(orig_shape)


def init_ode_func_params(key, latent_dim, n_units, dtype=jnp.float32):
    """Deterministic synthetic init matching utils.init_network_weights:
    weights ~ Normal(0, std=0.1), biases = 0."""
    k1, k2, k3 = jax.random.split(key, 3)
    w1 = 0.1 * jax.random.normal(k1, (latent_dim, n_units), dtype)
    b1 = jnp.zeros((1, n_units), dtype)
    w2 = 0.1 * jax.random.normal(k2, (n_units, n_units), dtype)
    b2 = jnp.zeros((1, n_units), dtype)
    w3 = 0.1 * jax.random.normal(k3, (n_units, latent_dim), dtype)
    b3 = jnp.zeros((1, latent_dim), dtype)
    return (w1, b1, w2, b2, w3, b3)


def _reference_forward(t_local, y, params, backwards=False):
    """Pure-JAX reference of the PyTorch forward for correctness checks."""
    del t_local
    w1, b1, w2, b2, w3, b3 = params
    h = jnp.tanh(y @ w1 + b1)
    h = jnp.tanh(h @ w2 + b2)
    grad = h @ w3 + b3
    return -grad if backwards else grad


if __name__ == "__main__":
    # Small shapes consistent with latent-ODE usage:
    # y: [n_traj_samples=2, n_traj=8, latent_dim=32], hidden units = 64.
    n_traj_samples, n_traj, latent_dim, n_units = 2, 8, 32, 64

    key = jax.random.PRNGKey(0)
    ky, kp = jax.random.split(key)
    y = jax.random.normal(ky, (n_traj_samples, n_traj, latent_dim),
                          jnp.float32)
    t_local = jnp.float32(0.5)  # unused by the gradient net, kept for parity
    params = init_ode_func_params(kp, latent_dim, n_units)

    # Main path: B=16 -> single grid step (tile == padded batch).
    grad = ode_func_forward(t_local, y, params, backwards=False)
    jax.block_until_ready(grad)
    grad_bwd = ode_func_forward(t_local, y, params, backwards=True)
    jax.block_until_ready(grad_bwd)

    ref = _reference_forward(t_local, y, params, backwards=False)
    assert grad.shape == y.shape
    assert jnp.allclose(grad, ref, atol=1e-5, rtol=1e-5)
    assert jnp.allclose(grad_bwd, -ref, atol=1e-5, rtol=1e-5)

    # Exercise the internal-padding + multi-step-grid path (odd batch, small
    # forced tile) to make sure the large-B configuration is also correct.
    y_odd = jax.random.normal(jax.random.PRNGKey(1), (3, 7, latent_dim),
                              jnp.float32)  # B = 21 -> padded to 24, 3 tiles
    grad_odd = ode_func_forward(t_local, y_odd, params, backwards=False,
                                max_batch_tile=8)
    jax.block_until_ready(grad_odd)
    ref_odd = _reference_forward(t_local, y_odd, params, backwards=False)
    assert grad_odd.shape == y_odd.shape
    assert jnp.allclose(grad_odd, ref_odd, atol=1e-5, rtol=1e-5)

    print("KERNEL_OK")
</pallas_src>

<mosaic_0001>
module attributes {stable_mosaic.version = 11 : i64} {
  func.func @_ode_func_kernel(%arg0: i32, %arg1: memref<16x32xf32, #tpu.memory_space<vmem>>, %arg2: memref<32x64xf32, #tpu.memory_space<vmem>>, %arg3: memref<1x64xf32, #tpu.memory_space<vmem>>, %arg4: memref<64x64xf32, #tpu.memory_space<vmem>>, %arg5: memref<1x64xf32, #tpu.memory_space<vmem>>, %arg6: memref<64x32xf32, #tpu.memory_space<vmem>>, %arg7: memref<1x32xf32, #tpu.memory_space<vmem>>, %arg8: memref<16x32xf32, #tpu.memory_space<vmem>>) attributes {dimension_semantics = [#tpu.dimension_semantics<parallel>], iteration_bounds = array<i64: 1>, scalar_prefetch = 0 : i64, scratch_operands = 0 : i64, tpu.core_type = #tpu.core_type<tc>, window_params = [{transform_indices = @transform_0, window_bounds = array<i64: 16, 32>}, {pipeline_mode = #tpu.pipeline_mode<synchronous>, transform_indices = @transform_1, window_bounds = array<i64: 32, 64>}, {pipeline_mode = #tpu.pipeline_mode<synchronous>, transform_indices = @transform_2, window_bounds = array<i64: 1, 64>}, {pipeline_mode = #tpu.pipeline_mode<synchronous>, transform_indices = @transform_3, window_bounds = array<i64: 64, 64>}, {pipeline_mode = #tpu.pipeline_mode<synchronous>, transform_indices = @transform_4, window_bounds = array<i64: 1, 64>}, {pipeline_mode = #tpu.pipeline_mode<synchronous>, transform_indices = @transform_5, window_bounds = array<i64: 64, 32>}, {pipeline_mode = #tpu.pipeline_mode<synchronous>, transform_indices = @transform_6, window_bounds = array<i64: 1, 32>}, {transform_indices = @transform_7, window_bounds = array<i64: 16, 32>}]} {
    %c0 = arith.constant 0 : index
    %c0_0 = arith.constant 0 : index
    %0 = vector.load %arg1[%c0, %c0_0] : memref<16x32xf32, #tpu.memory_space<vmem>>, vector<16x32xf32>
    %c0_1 = arith.constant 0 : index
    %c0_2 = arith.constant 0 : index
    %1 = vector.load %arg2[%c0_1, %c0_2] : memref<32x64xf32, #tpu.memory_space<vmem>>, vector<32x64xf32>
    %cst = arith.constant dense<0.000000e+00> : vector<16x64xf32>
    %2 = tpu.matmul %0, %1, %cst {dimension_numbers = #tpu.dot_dimension_numbers<[1], [0], [0], [1], [0, 0, 1, 1], [], []>} : vector<16x32xf32>, vector<32x64xf32>, vector<16x64xf32> -> vector<16x64xf32>
    %c0_3 = arith.constant 0 : index
    %c0_4 = arith.constant 0 : index
    %3 = vector.load %arg3[%c0_3, %c0_4] : memref<1x64xf32, #tpu.memory_space<vmem>>, vector<1x64xf32>
    %4 = vector.broadcast %3 : vector<1x64xf32> to vector<16x64xf32>
    %5 = arith.addf %2, %4 : vector<16x64xf32>
    %6 = math.tanh %5 : vector<16x64xf32>
    %c0_5 = arith.constant 0 : index
    %c0_6 = arith.constant 0 : index
    %7 = vector.load %arg4[%c0_5, %c0_6] : memref<64x64xf32, #tpu.memory_space<vmem>>, vector<64x64xf32>
    %cst_7 = arith.constant dense<0.000000e+00> : vector<16x64xf32>
    %8 = tpu.matmul %6, %7, %cst_7 {dimension_numbers = #tpu.dot_dimension_numbers<[1], [0], [0], [1], [0, 0, 1, 1], [], []>} : vector<16x64xf32>, vector<64x64xf32>, vector<16x64xf32> -> vector<16x64xf32>
    %c0_8 = arith.constant 0 : index
    %c0_9 = arith.constant 0 : index
    %9 = vector.load %arg5[%c0_8, %c0_9] : memref<1x64xf32, #tpu.memory_space<vmem>>, vector<1x64xf32>
    %10 = vector.broadcast %9 : vector<1x64xf32> to vector<16x64xf32>
    %11 = arith.addf %8, %10 : vector<16x64xf32>
    %12 = math.tanh %11 : vector<16x64xf32>
    %c0_10 = arith.constant 0 : index
    %c0_11 = arith.constant 0 : index
    %13 = vector.load %arg6[%c0_10, %c0_11] : memref<64x32xf32, #tpu.memory_space<vmem>>, vector<64x32xf32>
    %cst_12 = arith.constant dense<0.000000e+00> : vector<16x32xf32>
    %14 = tpu.matmul %12, %13, %cst_12 {dimension_numbers = #tpu.dot_dimension_numbers<[1], [0], [0], [1], [0, 0, 1, 1], [], []>} : vector<16x64xf32>, vector<64x32xf32>, vector<16x32xf32> -> vector<16x32xf32>
    %c0_13 = arith.constant 0 : index
    %c0_14 = arith.constant 0 : index
    %15 = vector.load %arg7[%c0_13, %c0_14] : memref<1x32xf32, #tpu.memory_space<vmem>>, vector<1x32xf32>
    %16 = vector.broadcast %15 : vector<1x32xf32> to vector<16x32xf32>
    %17 = arith.addf %14, %16 : vector<16x32xf32>
    %c0_15 = arith.constant 0 : index
    %c0_16 = arith.constant 0 : index
    %18 = vector.load %arg8[%c0_15, %c0_16] : memref<16x32xf32, #tpu.memory_space<vmem>>, vector<16x32xf32>
    tpu.vector_store %arg8[%c0_15, %c0_16], %17 {strides = array<i32>} : memref<16x32xf32, #tpu.memory_space<vmem>>, vector<16x32xf32>,
    return
  }
  func.func @transform_0(%arg0: i32) -> (i32, i32) {
    %c0_i32 = arith.constant 0 : i32
    %c0_i32_0 = arith.constant 0 : i32
    return %arg0, %c0_i32 : i32, i32
  }
  func.func @transform_1(%arg0: i32) -> (i32, i32) {
    %c0_i32 = arith.constant 0 : i32
    %c0_i32_0 = arith.constant 0 : i32
    %c0_i32_1 = arith.constant 0 : i32
    return %c0_i32, %c0_i32_0 : i32, i32
  }
  func.func @transform_2(%arg0: i32) -> (i32, i32) {
    %c0_i32 = arith.constant 0 : i32
    %c0_i32_0 = arith.constant 0 : i32
    %c0_i32_1 = arith.constant 0 : i32
    return %c0_i32, %c0_i32_0 : i32, i32
  }
  func.func @transform_3(%arg0: i32) -> (i32, i32) {
    %c0_i32 = arith.constant 0 : i32
    %c0_i32_0 = arith.constant 0 : i32
    %c0_i32_1 = arith.constant 0 : i32
    return %c0_i32, %c0_i32_0 : i32, i32
  }
  func.func @transform_4(%arg0: i32) -> (i32, i32) {
    %c0_i32 = arith.constant 0 : i32
    %c0_i32_0 = arith.constant 0 : i32
    %c0_i32_1 = arith.constant 0 : i32
    return %c0_i32, %c0_i32_0 : i32, i32
  }
  func.func @transform_5(%arg0: i32) -> (i32, i32) {
    %c0_i32 = arith.constant 0 : i32
    %c0_i32_0 = arith.constant 0 : i32
    %c0_i32_1 = arith.constant 0 : i32
    return %c0_i32, %c0_i32_0 : i32, i32
  }
  func.func @transform_6(%arg0: i32) -> (i32, i32) {
    %c0_i32 = arith.constant 0 : i32
    %c0_i32_0 = arith.constant 0 : i32
    %c0_i32_1 = arith.constant 0 : i32
    return %c0_i32, %c0_i32_0 : i32, i32
  }
  func.func @transform_7(%arg0: i32) -> (i32, i32) {
    %c0_i32 = arith.constant 0 : i32
    %c0_i32_0 = arith.constant 0 : i32
    return %arg0, %c0_i32 : i32, i32
  }
}

</mosaic_0001>

<bundles_post_ra>
// kernel: tpu_custom_call.1
= control target key start
LH: loop header
LB: loop body
LE: loop exit
PB: predicated region body
PF: predicated region fallthrough
CT: control target
= control target key end

     0   :  { %12 = vsyncpa [#allocation3], 0  ;;  %s405_s0 = inlined_call_operand.hbm [shape: f32[16,32], index: 0, kind: input, shape index: {}]   ;;  %s406_s1 = inlined_call_operand.vmem [shape: f32[32,64], index: 1, kind: input, shape index: {}]   ;;  %s407_s2 = inlined_call_operand.vmem [shape: f32[1,64], index: 2, kind: input, shape index: {}]   ;;  %s408_s3 = inlined_call_operand.vmem [shape: f32[64,64], index: 3, kind: input, shape index: {}]   ;;  %s409_s4 = inlined_call_operand.vmem [shape: f32[1,64], index: 4, kind: input, shape index: {}]   ;;  %s410_s5 = inlined_call_operand.vmem [shape: f32[64,32], index: 5, kind: input, shape index: {}]   ;;  %s411_s6 = inlined_call_operand.vmem [shape: f32[1,32], index: 6, kind: input, shape index: {}]   ;;  %s412_s7 = inlined_call_operand.hbm [shape: f32[16,32], index: 7, kind: output, shape index: {}]  }
   0x1   :  { %13 = vsyncpa [#allocation4], 0  ;;  %s18_s26 = sshll.u32 %s405_s0, 4  ;;  %s272_s27 = smov [#allocation2]   ;;  %s19_s26 = int_to_ptr.hbm [resolvable:$true] %s18_s26 }
   0x2   :  { %s20_s28 = sshll.u32 %s272_s27, 4  ;;  %s273_s29 = smov 128   ;;  %s21_s28 = int_to_ptr.vmem [resolvable:$true] %s20_s28 }
   0x3   :  { %s274_s30 = smov 8  }
   0x4   :  { %26 = dma.hbm_to_vmem [thread:$0]  %s19_s26, 256, %s21_s28, [#allocation3], %s273_s29, %s273_s29, %s274_s30  }
   0x5   :  { %268 = dma.done.wait [#allocation3], 256  }
   0x6   :  { %269 = vsyncadd [#allocation3], 4294967040  ;;  %v48_v0 = vld [vmem:[%s406_s1 + $0x18] sm:$0xff]  ;;  %v47_v1 = vld [vmem:[%s406_s1 + $0x10] sm:$0xff]  ;;  %vm53_vm0 = vcmask 261120   ;;  %vm97_vm1 = vcmask 523264  }
   0x7   :  { %72 = vmatpush.msra.mxu0 %v48_v0  ;;  %v46_v2 = vld [vmem:[%s406_s1 + $0x8] sm:$0xff]  ;;  %v92_v3 = vld [vmem:[%s408_s3 + $0x38] sm:$0xff]  ;;  %v91_v4 = vld [vmem:[%s408_s3 + $0x30] sm:$0xff]  ;;  %s178_s8 = sshll.u32 %s412_s7, 4  ;;  %s179_s8 = int_to_ptr.hbm [resolvable:$true] %s178_s8 }
   0x8   :  { %112 = vmatpush.msra.mxu1 %v92_v3  ;;  %v45_v5 = vld [vmem:[%s406_s1] sm:$0xff]  ;;  %v90_v6 = vld [vmem:[%s408_s3 + $0x28] sm:$0xff]  ;;  %197 = vmatpush.msra.mxu3 %v92_v3  ;;  %v88_v10 = vld [vmem:[%s408_s3 + $0x18] sm:$0xff] }
   0x9   :  { %73 = vmatpush.msra.mxu0 %v47_v1  ;;  %v43_v7 = vld [vmem:[#allocation2] sm:$0xff]  ;;  %v44_v8 = vld [vmem:[#allocation2 + $0x8] sm:$0xff]  ;;  %v87_v11 = vld [vmem:[%s408_s3 + $0x10] sm:$0xff] }
   0xa   :  { %113 = vmatpush.msra.mxu1 %v91_v4  ;;  %198 = vmatpush.msra.mxu3 %v91_v4  ;;  %v89_v9 = vld [vmem:[%s408_s3 + $0x20] sm:$0xff]  ;;  %v86_v12 = vld [vmem:[%s408_s3 + $0x8] sm:$0xff]  ;;  %v136_v14 = vld [vmem:[%s410_s5 + $0x38] sm:$0xff] }
   0xb   :  { %74 = vmatpush.msra.mxu0 %v46_v2  ;;  %v85_v13 = vld [vmem:[%s408_s3] sm:$0xff]  ;;  %v135_v15 = vld [vmem:[%s410_s5 + $0x30] sm:$0xff]  ;;  %155 = vmatpush.msra.mxu2 %v136_v14  ;;  %v134_v16 = vld [vmem:[%s410_s5 + $0x28] sm:$0xff] }
   0xc   :  { %114 = vmatpush.msra.mxu1 %v90_v6  ;;  %199 = vmatpush.msra.mxu3 %v90_v6  ;;  %v209_v17 = vld [vmem:[%s407_s2] ss:$0 sm:$0xff]  ;;  %v132_v25 = vld [vmem:[%s410_s5 + $0x18] sm:$0xff]  ;;  %v131_v26 = vld [vmem:[%s410_s5 + $0x10] sm:$0xff] }
   0xd   :  { %75 = vmatpush.msra.mxu0 %v45_v5  ;;  %156 = vmatpush.msra.mxu2 %v135_v15  ;;  %v133_v24 = vld [vmem:[%s410_s5 + $0x20] sm:$0xff]  ;;  %v130_v27 = vld [vmem:[%s410_s5 + $0x8] sm:$0xff] }
   0xe   :  { %191 = vmatmul.msk.f32.vlgmr.msra.gmra.mxu0 %vm53_vm0, %v43_v7  ;;  %115 = vmatpush.msra.mxu1 %v89_v9  ;;  %v129_v28 = vld [vmem:[%s410_s5] sm:$0xff] }
   0xf   :  { %200 = vmatpush.msra.mxu3 %v89_v9  ;;  %157 = vmatpush.msra.mxu2 %v134_v16  ;;  %v210_v29 = vld [vmem:[%s409_s4] ss:$0 sm:$0xff]  ;;  %s275_s4 = smov [#allocation5]  }
  0x10   :  { %116 = vmatpush.msra.mxu1 %v88_v10  ;;  %v211_v36 = vld [vmem:[%s411_s6] ss:$0 sm:$0xff]  ;;  %s176_s26 = sshll.u32 %s275_s4, 4  ;;  %s177_s26 = int_to_ptr.vmem [resolvable:$true] %s176_s26 }
  0x11   :  { %201 = vmatpush.msra.mxu3 %v88_v10  ;;  %158 = vmatpush.msra.mxu2 %v133_v24 }
  0x12   :  { %117 = vmatpush.msra.mxu1 %v87_v11 }
  0x13   :  { %202 = vmatpush.msra.mxu3 %v87_v11  ;;  %159 = vmatpush.msra.mxu2 %v132_v25 }
  0x14   :  { %118 = vmatpush.msra.mxu1 %v86_v12 }
  0x15   :  { %203 = vmatpush.msra.mxu3 %v86_v12  ;;  %160 = vmatpush.msra.mxu2 %v131_v26 }
  0x16   :  { %192 = vmatmul.msk.f32.gmra.mxu0 %vm53_vm0, %v44_v8  ;;  %119 = vmatpush.msra.mxu1 %v85_v13 }
  0x17   :  { %204 = vmatpush.msra.mxu3 %v85_v13  ;;  %161 = vmatpush.msra.mxu2 %v130_v27 }
  0x19   :  { %162 = vmatpush.msra.mxu2 %v129_v28 }
  0x8b   :  { %v77_v18 = vpop.f32.mrf.mxu0 }
  0x8c   :  { %v78_v19 = vadd.f32 %v209_v17, %v77_v18 }
  0x8e   :  { %212 = vtanh.f32 %v78_v19 }
  0x93   :  { %v80_v20 = vpop.f32.mrf.mxu0 }
  0x94   :  { %v213_v21 = vpop.eup %212  ;;  %v81_v22 = vadd.f32 %v209_v17, %v80_v20 }
  0x95   :  { %193 = vmatmul.msk.f32.vlgmr.msra.gmra.mxu1 %vm97_vm1, %v213_v21 }
  0x96   :  { %214 = vtanh.f32 %v81_v22 }
  0x9c   :  { %v215_v23 = vpop.eup %214 }
  0x9d   :  { %194 = vmatmul.msk.f32.vlgmr.msra.gmra.mxu3 %vm97_vm1, %v215_v23 }
 0x112   :  { %v121_v30 = vpop.f32.mrf.mxu1 }
 0x113   :  { %v122_v31 = vadd.f32 %v210_v29, %v121_v30 }
 0x115   :  { %216 = vtanh.f32 %v122_v31 }
 0x11b   :  { %v217_v32 = vpop.eup %216 }
 0x11c   :  { %195 = vmatmul.msk.f32.vlgmr.msra.gmra.mxu2 %vm97_vm1, %v217_v32 }
 0x120   :  { %v124_v33 = vpop.f32.mrf.mxu3 }
 0x121   :  { %v125_v34 = vadd.f32 %v210_v29, %v124_v33 }
 0x123   :  { %218 = vtanh.f32 %v125_v34 }
 0x129   :  { %v219_v35 = vpop.eup %218 }
 0x12a   :  { %196 = vmatmul.msk.f32.gmra.mxu2 %vm97_vm1, %v219_v35 }
 0x19f   :  { %v164_v37 = vpop.f32.mrf.mxu2 }
 0x1a0   :  { %v165_v38 = vadd.f32 %v211_v36, %v164_v37 }
 0x1a2   :  { %170 = vst.msk [vmem:[#allocation5] sm:$0xff] %vm53_vm0, %v165_v38 }
 0x1ad   :  { %v167_v39 = vpop.f32.mrf.mxu2 }
 0x1ae   :  { %v168_v40 = vadd.f32 %v211_v36, %v167_v39 }
 0x1b0   :  { %171 = vst.msk [vmem:[#allocation5 + $0x8] sm:$0xff] %vm53_vm0, %v168_v40 }
 0x1b1   :  { %184 = dma.vmem_to_hbm [thread:$0]  %s177_s26, 256, %s179_s8, [#allocation4], %s273_s29, %s273_s29, %s274_s30  }
 0x1b2   :  { %270 = dma.done.wait [#allocation4], 256  }
 0x1b3   :  { %271 = vsyncadd [#allocation4], 4294967040 }
 0x1b4   :  { %189 = vsyncpa [#allocation3], 1 }
 0x1b5   :  { %190 = vsyncpa [#allocation4], 1 }

</bundles_post_ra>
